<compile_context>
chip_gen: v7x
topology: tpu7x:2x2x1
jax: 0.10.0
libtpu: 0.0.40
codegen_flags: <defaults>
</compile_context>

<pallas_src>
import functools

import jax
import jax.numpy as jnp
from jax.experimental import pallas as pl
from jax.experimental.pallas import tpu as pltpu


def _kernel(x_ref, w_ref, b_ref, o_ref):
    # x_ref: (tm, K) rows of x; w_ref: (1, K) folded weight (f32, lane-dense);
    # b_ref: (1,) scalar bias in SMEM.
    # VPU multiply (promotes bf16 x to f32) + XLU cross-lane reduce; f32 accumulate.
    prod = x_ref[...] * w_ref[...]                      # (tm, K) f32
    acc = jnp.sum(prod, axis=-1, keepdims=True)         # (tm, 1) f32
    o_ref[...] = (acc + b_ref[0]).astype(o_ref.dtype)


def _round_up(a, b):
    return ((a + b - 1) // b) * b


def binary_head_with_pos(x, w_proj, b_proj, w_lin, b_lin, *, dim, tm=16384):
    """x: (..., dim+2) (f32 or bf16 — streamed in its native dtype).

    w_proj: (dim, 2)   (PyTorch layout)
    b_proj: (dim,)
    w_lin : (1, 2*dim)
    b_lin : (1,)
    Returns (..., 1) float32.
    """
    K = dim + 2
    lead_shape = x.shape[:-1]
    assert x.shape[-1] == K
    M = 1
    for s in lead_shape:
        M *= s
    x2d = x.reshape(M, K)                                   # native dtype, no copy pass

    # ---- fold proj into the final linear (exact: everything is linear) ----
    # Kept in f32 end-to-end (free on the VPU; avoids bf16 rounding of w_pos).
    wlin_t = jnp.transpose(w_lin).astype(jnp.float32)        # (2*dim, 1)
    wproj_t = jnp.transpose(w_proj).astype(jnp.float32)      # (2, dim)
    w_val = wlin_t[:dim]                                     # (dim, 1)
    w_pos = wproj_t @ wlin_t[dim:]                           # (2, 1)
    w_comb = jnp.concatenate([w_val, w_pos], axis=0)         # (K, 1)
    w_row = jnp.transpose(w_comb).reshape(1, K)              # (1, K) lane-dense, f32
    b_comb = (b_proj.astype(jnp.float32) @ wlin_t[dim:, 0]
              + b_lin.astype(jnp.float32)[0]).reshape(1)     # (1,) scalar bias

    # ---- row-tile selection with real (lane/sublane-padded) VMEM accounting ----
    itemsize = jnp.dtype(x2d.dtype).itemsize
    sublane = max(8, 32 // max(1, itemsize))       # 8 f32 / 16 bf16 / 32 int8-fp8
    x_row_bytes = _round_up(K, 128) * itemsize     # lane-padded input row in VMEM
    o_row_bytes = 128 * 4                          # (tm, 1) f32 output also pads to 128 lanes
    pipelined_budget = 24 << 20                    # double-buffered input + output tiles
    max_tm_vmem = pipelined_budget // (2 * (x_row_bytes + o_row_bytes))
    max_tm_vmem = max(sublane, (max_tm_vmem // sublane) * sublane)

    tm_eff = min(tm, _round_up(M, sublane), max_tm_vmem)
    tm_eff = max(sublane, (tm_eff // sublane) * sublane)

    # Megacore (v7x): if everything fits in one program but each half would
    # still stream >= 2 MiB of x, split in two so both TensorCores get work.
    # (On single-TC v5e/v6e this costs at most one extra ~0.35 us step.)
    if pl.cdiv(M, tm_eff) < 2:
        half = _round_up(pl.cdiv(M, 2), sublane)
        if half * K * itemsize >= (2 << 20):
            tm_eff = half

    grid = (pl.cdiv(M, tm_eff),)                   # partial last block is masked by Pallas

    vmem_need = (2 * tm_eff * (x_row_bytes + o_row_bytes)   # double-buffered x + out
                 + 4 * x_row_bytes                           # resident weight row (buffered)
                 + (2 << 20))                                # slack
    vmem_limit = int(min(48 << 20, max(16 << 20, vmem_need)))

    cost = pl.CostEstimate(
        flops=2 * M * K,
        transcendentals=0,
        bytes_accessed=M * K * itemsize + 4 * M + 4 * K,
    )

    out = pl.pallas_call(
        _kernel,
        out_shape=jax.ShapeDtypeStruct((M, 1), jnp.float32),
        grid_spec=pltpu.PrefetchScalarGridSpec(
            num_scalar_prefetch=0,
            grid=grid,
            in_specs=[
                pl.BlockSpec((tm_eff, K), lambda i: (i, 0)),           # streamed x rows
                pl.BlockSpec((1, K), lambda i: (0, 0)),                # resident weight row (f32)
                pl.BlockSpec(memory_space=pltpu.MemorySpace.SMEM),     # scalar bias
            ],
            out_specs=pl.BlockSpec((tm_eff, 1), lambda i: (i, 0)),
        ),
        compiler_params=pltpu.CompilerParams(
            dimension_semantics=("parallel",),
            vmem_limit_bytes=vmem_limit),
        cost_estimate=cost,
    )(x2d, w_row, b_comb)

    return out.reshape(*lead_shape, 1)


def _reference(x, w_proj, b_proj, w_lin, b_lin, dim):
    # Un-fused reference matching the PyTorch module exactly (f32 math).
    xf = x.astype(jnp.float32)
    x_value = xf[..., :dim]
    x_pos = jnp.einsum("...k,dk->...d", xf[..., dim:dim + 2],
                       w_proj.astype(jnp.float32)) + b_proj.astype(jnp.float32)
    feat = jnp.concatenate([x_value, x_pos], axis=-1)
    return jnp.einsum("...k,ok->...o", feat, w_lin.astype(jnp.float32)) \
        + b_lin.astype(jnp.float32)


if __name__ == "__main__":
    key = jax.random.PRNGKey(0)

    # ---- test 1: small shapes matching the module spec ----
    dim = 32
    batch, seq = 2, 8
    k_x, k_wp, k_bp, k_wl, k_bl, key = jax.random.split(key, 6)

    x = jax.random.normal(k_x, (batch, seq, dim + 2), dtype=jnp.float32)
    w_proj = 0.01 * jax.random.normal(k_wp, (dim, 2), dtype=jnp.float32)
    b_proj = 0.1 * jax.random.normal(k_bp, (dim,), dtype=jnp.float32)
    w_lin = 0.01 * jax.random.normal(k_wl, (1, 2 * dim), dtype=jnp.float32)
    b_lin = 0.1 * jax.random.normal(k_bl, (1,), dtype=jnp.float32)

    fn = jax.jit(functools.partial(binary_head_with_pos, dim=dim))
    out = jax.block_until_ready(fn(x, w_proj, b_proj, w_lin, b_lin))
    ref = _reference(x, w_proj, b_proj, w_lin, b_lin, dim)
    assert out.shape == (batch, seq, 1), out.shape
    assert jnp.allclose(out, ref, atol=1e-5, rtol=1e-5), \
        float(jnp.max(jnp.abs(out - ref)))

    # ---- test 2: multi-program grid with a masked partial last block ----
    dim2 = 64
    batch2, seq2 = 4, 600            # M = 2400 rows, tm=256 -> 10 programs, last partial
    k_x, k_wp, k_bp, k_wl, k_bl, key = jax.random.split(key, 6)

    x2 = jax.random.normal(k_x, (batch2, seq2, dim2 + 2), dtype=jnp.float32)
    w_proj2 = 0.01 * jax.random.normal(k_wp, (dim2, 2), dtype=jnp.float32)
    b_proj2 = 0.1 * jax.random.normal(k_bp, (dim2,), dtype=jnp.float32)
    w_lin2 = 0.01 * jax.random.normal(k_wl, (1, 2 * dim2), dtype=jnp.float32)
    b_lin2 = 0.1 * jax.random.normal(k_bl, (1,), dtype=jnp.float32)

    fn2 = jax.jit(functools.partial(binary_head_with_pos, dim=dim2, tm=256))
    out2 = jax.block_until_ready(fn2(x2, w_proj2, b_proj2, w_lin2, b_lin2))
    ref2 = _reference(x2, w_proj2, b_proj2, w_lin2, b_lin2, dim2)
    assert out2.shape == (batch2, seq2, 1), out2.shape
    assert jnp.allclose(out2, ref2, atol=1e-5, rtol=1e-5), \
        float(jnp.max(jnp.abs(out2 - ref2)))

    print("KERNEL_OK")
</pallas_src>

<mosaic_0001>
module attributes {stable_mosaic.version = 11 : i64} {
  func.func @_kernel(%arg0: i32, %arg1: memref<16x34xf32, #tpu.memory_space<vmem>>, %arg2: memref<1x34xf32, #tpu.memory_space<vmem>>, %arg3: memref<1xf32, #tpu.memory_space<smem>>, %arg4: memref<16x1xf32, #tpu.memory_space<vmem>>) attributes {dimension_semantics = [#tpu.dimension_semantics<parallel>], iteration_bounds = array<i64: 1>, scalar_prefetch = 0 : i64, scratch_operands = 0 : i64, tpu.core_type = #tpu.core_type<tc>, window_params = [{transform_indices = @transform_0, window_bounds = array<i64: 16, 34>}, {pipeline_mode = #tpu.pipeline_mode<synchronous>, transform_indices = @transform_1, window_bounds = array<i64: 1, 34>}, {transform_indices = @transform_2, window_bounds = array<i64: 1>}, {transform_indices = @transform_3, window_bounds = array<i64: 16, 1>}]} {
    %c0 = arith.constant 0 : index
    %c0_0 = arith.constant 0 : index
    %0 = vector.load %arg1[%c0, %c0_0] : memref<16x34xf32, #tpu.memory_space<vmem>>, vector<16x34xf32>
    %c0_1 = arith.constant 0 : index
    %c0_2 = arith.constant 0 : index
    %1 = vector.load %arg2[%c0_1, %c0_2] : memref<1x34xf32, #tpu.memory_space<vmem>>, vector<1x34xf32>
    %2 = vector.broadcast %1 : vector<1x34xf32> to vector<16x34xf32>
    %3 = arith.mulf %0, %2 : vector<16x34xf32>
    %cst = arith.constant dense<0.000000e+00> : vector<16xf32>
    %4 = vector.multi_reduction <add>, %3, %cst [1] : vector<16x34xf32> to vector<16xf32>
    %5 = vector.shape_cast %4 : vector<16xf32> to vector<16x1xf32>
    %c0_3 = arith.constant 0 : index
    %6 = memref.load %arg3[%c0_3] : memref<1xf32, #tpu.memory_space<smem>>
    %7 = vector.broadcast %6 : f32 to vector<16x1xf32>
    %8 = arith.addf %5, %7 : vector<16x1xf32>
    %c0_4 = arith.constant 0 : index
    %c0_5 = arith.constant 0 : index
    %9 = vector.load %arg4[%c0_4, %c0_5] : memref<16x1xf32, #tpu.memory_space<vmem>>, vector<16x1xf32>
    tpu.vector_store %arg4[%c0_4, %c0_5], %8 {strides = array<i32>} : memref<16x1xf32, #tpu.memory_space<vmem>>, vector<16x1xf32>,
    return
  }
  func.func @transform_0(%arg0: i32) -> (i32, i32) {
    %c0_i32 = arith.constant 0 : i32
    %c0_i32_0 = arith.constant 0 : i32
    return %arg0, %c0_i32 : i32, i32
  }
  func.func @transform_1(%arg0: i32) -> (i32, i32) {
    %c0_i32 = arith.constant 0 : i32
    %c0_i32_0 = arith.constant 0 : i32
    %c0_i32_1 = arith.constant 0 : i32
    return %c0_i32, %c0_i32_0 : i32, i32
  }
  func.func @transform_2(%arg0: i32) -> i32 {
    %c0_i32 = arith.constant 0 : i32
    %c0_i32_0 = arith.constant 0 : i32
    return %c0_i32 : i32
  }
  func.func @transform_3(%arg0: i32) -> (i32, i32) {
    %c0_i32 = arith.constant 0 : i32
    %c0_i32_0 = arith.constant 0 : i32
    return %arg0, %c0_i32 : i32, i32
  }
}

</mosaic_0001>

<bundles_post_ra>
// kernel: binary_head_with_pos.1
= control target key start
LH: loop header
LB: loop body
LE: loop exit
PB: predicated region body
PF: predicated region fallthrough
CT: control target
= control target key end

     0   :  { %vm26_vm0 = vcmask 277504   ;;  %vm37_vm1 = vcmask 7168   ;;  %s83_s0 = inlined_call_operand.vmem [shape: f32[16,34], index: 0, kind: input, shape index: {}]   ;;  %s84_s1 = inlined_call_operand.vmem [shape: f32[1,34], index: 1, kind: input, shape index: {}]   ;;  %s85_s2 = inlined_call_operand.<no memory space> [shape: f32[1], index: 2, kind: input, shape index: {}]   ;;  %s86_s3 = inlined_call_operand.vmem [shape: f32[16,1], index: 3, kind: output, shape index: {}]  }
   0x1   :  { %v15_v0 = vld [vmem:[%s83_s0] sm:$0xff]  ;;  %v16_v2 = vld [vmem:[%s83_s0 + $0x8] sm:$0xff]  ;;  %v34_v7 = vstv %s85_s2 }
   0x2   :  { %v44_v1 = vld [vmem:[%s84_s1] ss:$0 sm:$0xff] }
   0x3   :  { %v24_v3 = vmul.f32 %v44_v1, %v15_v0  ;;  %v25_v4 = vmul.f32 %v44_v1, %v16_v2 }
   0x5   :  { %v27_v5 = vsel %vm26_vm0, %v24_v3, 0.0  ;;  %v30_v6 = vsel %vm26_vm0, %v25_v4, 0.0 }
   0x6   :  { %28 = vadd.xlane.f32.xlu0 %v27_v5 }
   0xa   :  { %31 = vadd.xlane.f32.xlu0 %v30_v6 }
  0x93   :  { %v29_v8 = vpop.xlane.xlu0 %28 }
  0x94   :  { %v35_v9 = vadd.f32 %v34_v7, %v29_v8 }
  0x96   :  { %38 = vst.msk [vmem:[%s86_s3] sm:$0xff] %vm37_vm1, %v35_v9 }
  0x97   :  { %v32_v10 = vpop.xlane.xlu0 %31 }
  0x98   :  { %v36_v11 = vadd.f32 %v34_v7, %v32_v10 }
  0x9a   :  { %39 = vst.msk [vmem:[%s86_s3 + $0x8] sm:$0xff] %vm37_vm1, %v36_v11 }

</bundles_post_ra>
